<compile_context>
chip_gen: v5e
topology: v5e:2x2
jax: 0.10.0
libtpu: 0.0.40
codegen_flags: <defaults>
</compile_context>

<pallas_src>
import jax
import jax.numpy as jnp
from jax.experimental import pallas as pl
from jax.experimental.pallas import tpu as pltpu

IN_F = 100
H1, H2, OUT = 180, 270, 360
# lane-dense (multiple-of-128) padded hidden widths (K of layers 2/3);
# the final output width stays the real 360 (== full array dim).
H1P, H2P = 256, 384
BATCH_TILE = 1024  # sweep 512-2048; ~11 MB VMEM at 1024 fits v5e/v6e/v7x


def _mlp3_kernel(x_ref, w1_ref, b1_ref, w2_ref, b2_ref, w3_ref, b3_ref, o_ref):
    # bf16 operands into the MXU, f32 accumulation, f32 bias adds.
    # (On v5e, if the VPU f32<->bf16 converts ever saturate, feeding f32
    #  activations to layers 2/3 is the fallback; bf16 kept as the default.)
    x = x_ref[...].astype(jnp.bfloat16)
    h1 = jnp.dot(x, w1_ref[...], preferred_element_type=jnp.float32) + b1_ref[...]
    h2 = (
        jnp.dot(h1.astype(jnp.bfloat16), w2_ref[...], preferred_element_type=jnp.float32)
        + b2_ref[...]
    )
    h3 = (
        jnp.dot(h2.astype(jnp.bfloat16), w3_ref[...], preferred_element_type=jnp.float32)
        + b3_ref[...]
    )
    o_ref[...] = h3.astype(o_ref.dtype)


def prepare_params(params):
    """One-time conversion from PyTorch layout (out,in)/(out,) to kernel layout.

    Returns (w1, b1, w2, b2, w3, b3): weights (in_padded, out[_padded]) in bf16,
    biases (1, out[_padded]) in f32. Padding is zeros, so padded lanes stay zero
    through every layer; the final layer is unpadded in N, so the kernel's
    output is exactly the real 360 columns.
    """

    def pad2(a, rows, cols):
        return jnp.pad(a, ((0, rows - a.shape[0]), (0, cols - a.shape[1])))

    w1 = pad2(params["w1"].T, IN_F, H1P).astype(jnp.bfloat16)   # (100, 256)
    w2 = pad2(params["w2"].T, H1P, H2P).astype(jnp.bfloat16)    # (256, 384)
    w3 = pad2(params["w3"].T, H2P, OUT).astype(jnp.bfloat16)    # (384, 360)
    b1 = pad2(params["b1"].reshape(1, -1), 1, H1P).astype(jnp.float32)  # (1, 256)
    b2 = pad2(params["b2"].reshape(1, -1), 1, H2P).astype(jnp.float32)  # (1, 384)
    b3 = params["b3"].reshape(1, -1).astype(jnp.float32)                # (1, 360)
    return (w1, b1, w2, b2, w3, b3)


def linear_module_1d(x, prepped, *, batch_tile=BATCH_TILE, out_dtype=jnp.float32):
    """x: (B, 100) float32. prepped: output of prepare_params. Returns (B, 360)."""
    B = x.shape[0]
    w1, b1, w2, b2, w3, b3 = prepped

    tb = B if B <= batch_tile else batch_tile
    grid = (pl.cdiv(B, tb),)

    flops = 2 * B * (IN_F * H1P + H1P * H2P + H2P * OUT)
    bytes_accessed = (
        x.size * x.dtype.itemsize
        + sum(a.size * a.dtype.itemsize for a in prepped)
        + B * OUT * jnp.dtype(out_dtype).itemsize
    )

    # Weights/biases: constant block index across the batch grid -> VMEM-resident.
    const = lambda shape: pl.BlockSpec(shape, lambda i: (0,) * len(shape))

    return pl.pallas_call(
        _mlp3_kernel,
        out_shape=jax.ShapeDtypeStruct((B, OUT), out_dtype),
        grid=grid,
        in_specs=[
            pl.BlockSpec((tb, IN_F), lambda i: (i, 0)),  # batch-tiled input
            const(w1.shape),
            const(b1.shape),
            const(w2.shape),
            const(b2.shape),
            const(w3.shape),
            const(b3.shape),
        ],
        # (tb, 360): last dim equals the full array dim -> legal block; the
        # kernel writes the real output directly (no post-kernel slice copy).
        out_specs=pl.BlockSpec((tb, OUT), lambda i: (i, 0)),
        compiler_params=pltpu.CompilerParams(
            dimension_semantics=("parallel",),   # shards batch tiles across v7x's 2 TCs
            vmem_limit_bytes=32 * 1024 * 1024,   # headroom for tb=1024 on v5e's small default
        ),
        cost_estimate=pl.CostEstimate(
            flops=flops, transcendentals=0, bytes_accessed=bytes_accessed
        ),
    )(x, w1, b1, w2, b2, w3, b3)


def init_params(key):
    """Deterministic init matching PyTorch nn.Linear default:
    U(-1/sqrt(fan_in), 1/sqrt(fan_in)) for both weight and bias (PyTorch layout)."""
    dims = [(180, 100), (270, 180), (360, 270)]
    params = {}
    for i, (out_f, in_f) in enumerate(dims, start=1):
        key, kw, kb = jax.random.split(key, 3)
        bound = 1.0 / (in_f ** 0.5)
        params[f"w{i}"] = jax.random.uniform(
            kw, (out_f, in_f), jnp.float32, -bound, bound
        )
        params[f"b{i}"] = jax.random.uniform(
            kb, (out_f,), jnp.float32, -bound, bound
        )
    return params


if __name__ == "__main__":
    key = jax.random.PRNGKey(0)
    kx, kp = jax.random.split(key)

    B = 8
    x = jax.random.normal(kx, (B, 100), dtype=jnp.float32)
    params = init_params(kp)

    # One-time param prep (transposes / padding / bf16 cast hoisted out of the call).
    prepped = prepare_params(params)

    fwd = jax.jit(lambda inp: linear_module_1d(inp, prepped))
    out = jax.block_until_ready(fwd(x))

    # Reference in plain JAX f32 (same math as the PyTorch module).
    ref = x
    for i in (1, 2, 3):
        ref = ref @ params[f"w{i}"].T + params[f"b{i}"]

    assert out.shape == (B, 360), out.shape
    # bf16 weights/activations into the MXU with f32 accumulation: loosen tolerance.
    max_err = float(jnp.max(jnp.abs(out - ref)))
    assert jnp.allclose(out, ref, atol=2e-2, rtol=2e-2), max_err

    print("KERNEL_OK")
</pallas_src>

<mosaic_0001>
module attributes {stable_mosaic.version = 11 : i64} {
  func.func @_mlp3_kernel(%arg0: i32, %arg1: memref<8x100xf32, #tpu.memory_space<vmem>>, %arg2: memref<100x256xbf16, #tpu.memory_space<vmem>>, %arg3: memref<1x256xf32, #tpu.memory_space<vmem>>, %arg4: memref<256x384xbf16, #tpu.memory_space<vmem>>, %arg5: memref<1x384xf32, #tpu.memory_space<vmem>>, %arg6: memref<384x360xbf16, #tpu.memory_space<vmem>>, %arg7: memref<1x360xf32, #tpu.memory_space<vmem>>, %arg8: memref<8x360xf32, #tpu.memory_space<vmem>>) attributes {dimension_semantics = [#tpu.dimension_semantics<parallel>], iteration_bounds = array<i64: 1>, scalar_prefetch = 0 : i64, scratch_operands = 0 : i64, tpu.core_type = #tpu.core_type<tc>, window_params = [{transform_indices = @transform_0, window_bounds = array<i64: 8, 100>}, {pipeline_mode = #tpu.pipeline_mode<synchronous>, transform_indices = @transform_1, window_bounds = array<i64: 100, 256>}, {pipeline_mode = #tpu.pipeline_mode<synchronous>, transform_indices = @transform_2, window_bounds = array<i64: 1, 256>}, {pipeline_mode = #tpu.pipeline_mode<synchronous>, transform_indices = @transform_3, window_bounds = array<i64: 256, 384>}, {pipeline_mode = #tpu.pipeline_mode<synchronous>, transform_indices = @transform_4, window_bounds = array<i64: 1, 384>}, {pipeline_mode = #tpu.pipeline_mode<synchronous>, transform_indices = @transform_5, window_bounds = array<i64: 384, 360>}, {pipeline_mode = #tpu.pipeline_mode<synchronous>, transform_indices = @transform_6, window_bounds = array<i64: 1, 360>}, {transform_indices = @transform_7, window_bounds = array<i64: 8, 360>}]} {
    %c0 = arith.constant 0 : index
    %c0_0 = arith.constant 0 : index
    %0 = vector.load %arg1[%c0, %c0_0] : memref<8x100xf32, #tpu.memory_space<vmem>>, vector<8x100xf32>
    %1 = arith.truncf %0 : vector<8x100xf32> to vector<8x100xbf16>
    %c0_1 = arith.constant 0 : index
    %c0_2 = arith.constant 0 : index
    %2 = vector.load %arg2[%c0_1, %c0_2] : memref<100x256xbf16, #tpu.memory_space<vmem>>, vector<100x256xbf16>
    %cst = arith.constant dense<0.000000e+00> : vector<8x256xf32>
    %3 = tpu.matmul %1, %2, %cst {dimension_numbers = #tpu.dot_dimension_numbers<[1], [0], [0], [1], [0, 0, 1, 1], [], []>} : vector<8x100xbf16>, vector<100x256xbf16>, vector<8x256xf32> -> vector<8x256xf32>
    %c0_3 = arith.constant 0 : index
    %c0_4 = arith.constant 0 : index
    %4 = vector.load %arg3[%c0_3, %c0_4] : memref<1x256xf32, #tpu.memory_space<vmem>>, vector<1x256xf32>
    %5 = vector.broadcast %4 : vector<1x256xf32> to vector<8x256xf32>
    %6 = arith.addf %3, %5 : vector<8x256xf32>
    %7 = arith.truncf %6 : vector<8x256xf32> to vector<8x256xbf16>
    %c0_5 = arith.constant 0 : index
    %c0_6 = arith.constant 0 : index
    %8 = vector.load %arg4[%c0_5, %c0_6] : memref<256x384xbf16, #tpu.memory_space<vmem>>, vector<256x384xbf16>
    %cst_7 = arith.constant dense<0.000000e+00> : vector<8x384xf32>
    %9 = tpu.matmul %7, %8, %cst_7 {dimension_numbers = #tpu.dot_dimension_numbers<[1], [0], [0], [1], [0, 0, 1, 1], [], []>} : vector<8x256xbf16>, vector<256x384xbf16>, vector<8x384xf32> -> vector<8x384xf32>
    %c0_8 = arith.constant 0 : index
    %c0_9 = arith.constant 0 : index
    %10 = vector.load %arg5[%c0_8, %c0_9] : memref<1x384xf32, #tpu.memory_space<vmem>>, vector<1x384xf32>
    %11 = vector.broadcast %10 : vector<1x384xf32> to vector<8x384xf32>
    %12 = arith.addf %9, %11 : vector<8x384xf32>
    %13 = arith.truncf %12 : vector<8x384xf32> to vector<8x384xbf16>
    %c0_10 = arith.constant 0 : index
    %c0_11 = arith.constant 0 : index
    %14 = vector.load %arg6[%c0_10, %c0_11] : memref<384x360xbf16, #tpu.memory_space<vmem>>, vector<384x360xbf16>
    %cst_12 = arith.constant dense<0.000000e+00> : vector<8x360xf32>
    %15 = tpu.matmul %13, %14, %cst_12 {dimension_numbers = #tpu.dot_dimension_numbers<[1], [0], [0], [1], [0, 0, 1, 1], [], []>} : vector<8x384xbf16>, vector<384x360xbf16>, vector<8x360xf32> -> vector<8x360xf32>
    %c0_13 = arith.constant 0 : index
    %c0_14 = arith.constant 0 : index
    %16 = vector.load %arg7[%c0_13, %c0_14] : memref<1x360xf32, #tpu.memory_space<vmem>>, vector<1x360xf32>
    %17 = vector.broadcast %16 : vector<1x360xf32> to vector<8x360xf32>
    %18 = arith.addf %15, %17 : vector<8x360xf32>
    %c0_15 = arith.constant 0 : index
    %c0_16 = arith.constant 0 : index
    %19 = vector.load %arg8[%c0_15, %c0_16] : memref<8x360xf32, #tpu.memory_space<vmem>>, vector<8x360xf32>
    tpu.vector_store %arg8[%c0_15, %c0_16], %18 {strides = array<i32>} : memref<8x360xf32, #tpu.memory_space<vmem>>, vector<8x360xf32>,
    return
  }
  func.func @transform_0(%arg0: i32) -> (i32, i32) {
    %c0_i32 = arith.constant 0 : i32
    %c0_i32_0 = arith.constant 0 : i32
    return %arg0, %c0_i32 : i32, i32
  }
  func.func @transform_1(%arg0: i32) -> (i32, i32) {
    %c0_i32 = arith.constant 0 : i32
    %c0_i32_0 = arith.constant 0 : i32
    %c0_i32_1 = arith.constant 0 : i32
    return %c0_i32, %c0_i32_0 : i32, i32
  }
  func.func @transform_2(%arg0: i32) -> (i32, i32) {
    %c0_i32 = arith.constant 0 : i32
    %c0_i32_0 = arith.constant 0 : i32
    %c0_i32_1 = arith.constant 0 : i32
    return %c0_i32, %c0_i32_0 : i32, i32
  }
  func.func @transform_3(%arg0: i32) -> (i32, i32) {
    %c0_i32 = arith.constant 0 : i32
    %c0_i32_0 = arith.constant 0 : i32
    %c0_i32_1 = arith.constant 0 : i32
    return %c0_i32, %c0_i32_0 : i32, i32
  }
  func.func @transform_4(%arg0: i32) -> (i32, i32) {
    %c0_i32 = arith.constant 0 : i32
    %c0_i32_0 = arith.constant 0 : i32
    %c0_i32_1 = arith.constant 0 : i32
    return %c0_i32, %c0_i32_0 : i32, i32
  }
  func.func @transform_5(%arg0: i32) -> (i32, i32) {
    %c0_i32 = arith.constant 0 : i32
    %c0_i32_0 = arith.constant 0 : i32
    %c0_i32_1 = arith.constant 0 : i32
    return %c0_i32, %c0_i32_0 : i32, i32
  }
  func.func @transform_6(%arg0: i32) -> (i32, i32) {
    %c0_i32 = arith.constant 0 : i32
    %c0_i32_0 = arith.constant 0 : i32
    %c0_i32_1 = arith.constant 0 : i32
    return %c0_i32, %c0_i32_0 : i32, i32
  }
  func.func @transform_7(%arg0: i32) -> (i32, i32) {
    %c0_i32 = arith.constant 0 : i32
    %c0_i32_0 = arith.constant 0 : i32
    return %arg0, %c0_i32 : i32, i32
  }
}

</mosaic_0001>

<bundles_post_ra>
// kernel: _lambda_.1
= control target key start
LH: loop header
LB: loop body
LE: loop exit
PB: predicated region body
PF: predicated region fallthrough
CT: control target
= control target key end

     0   :  { %12 = vsyncpa [#allocation3], 0  ;;  %s2219_s0 = inlined_call_operand.hbm [shape: f32[8,100], index: 0, kind: input, shape index: {}]   ;;  %s2220_s1 = inlined_call_operand.hbm [shape: bf16[100,256], index: 1, kind: input, shape index: {}]   ;;  %s2221_s2 = inlined_call_operand.hbm [shape: f32[1,256], index: 2, kind: input, shape index: {}]   ;;  %s2222_s3 = inlined_call_operand.hbm [shape: bf16[256,384], index: 3, kind: input, shape index: {}]   ;;  %s2223_s4 = inlined_call_operand.hbm [shape: f32[1,384], index: 4, kind: input, shape index: {}]   ;;  %s2224_s5 = inlined_call_operand.hbm [shape: bf16[384,360], index: 5, kind: input, shape index: {}]   ;;  %s2225_s6 = inlined_call_operand.vmem [shape: f32[1,360], index: 6, kind: input, shape index: {}]   ;;  %s2226_s7 = inlined_call_operand.hbm [shape: f32[8,360], index: 7, kind: output, shape index: {}]  }
   0x1   :  { %13 = vsyncpa [#allocation6], 0 }
   0x2   :  { %14 = vsyncpa [#allocation9], 0 }
   0x3   :  { %15 = vsyncpa [#allocation12], 0  ;;  %s32_s26 = sshll.u32 %s2220_s1, 4  ;;  %s33_s26 = int_to_ptr.hbm [resolvable:$true] %s32_s26 }
   0x4   :  { %16 = vsyncpa [#allocation4], 0  ;;  %s2130_s27 = smov [#allocation5]   ;;  %s56_s8 = sshll.u32 %s2222_s3, 4  ;;  %s57_s8 = int_to_ptr.hbm [resolvable:$true] %s56_s8 }
   0x5   :  { %s34_s28 = sshll.u32 %s2130_s27, 4  ;;  %s2131_s9 = smov 128   ;;  %s35_s28 = int_to_ptr.vmem [resolvable:$true] %s34_s28 }
   0x6   :  { %s2132_s10 = smov 8   ;;  %s2133_s11 = smov [#allocation8]  }
   0x7   :  { %40 = dma.hbm_to_vmem [thread:$0]  %s33_s26, 1664, %s35_s28, [#allocation6], %s2131_s9, %s2131_s9, %s2132_s10  }
   0x8   :  { %s58_s12 = sshll.u32 %s2133_s11, 4  ;;  %s2134_s13 = smov 192   ;;  %s59_s12 = int_to_ptr.vmem [resolvable:$true] %s58_s12 }
   0x9   :  { %s2135_s14 = smov 12   ;;  %s22_s16 = sshll.u32 %s2219_s0, 4  ;;  %s23_s16 = int_to_ptr.hbm [resolvable:$true] %s22_s16 }
   0xa   :  { %64 = dma.hbm_to_vmem [thread:$0]  %s57_s8, 6144, %s59_s12, [#allocation9], %s2134_s13, %s2134_s13, %s2135_s14  }
   0xb   :  { %s2136_s17 = smov [#allocation2]   ;;  %s46_s20 = sshll.u32 %s2221_s2, 4  ;;  %s47_s20 = int_to_ptr.hbm [resolvable:$true] %s46_s20 }
   0xc   :  { %s24_s18 = sshll.u32 %s2136_s17, 4  ;;  %s2137_s21 = smov [#allocation7]   ;;  %s25_s18 = int_to_ptr.vmem [resolvable:$true] %s24_s18 }
   0xd   :  { %27 = dma.hbm_to_vmem [thread:$0]  %s23_s16, 128, %s25_s18, [#allocation3]  }
   0xe   :  { %s48_s22 = sshll.u32 %s2137_s21, 4  ;;  %s70_s25 = sshll.u32 %s2223_s4, 4  ;;  %s49_s22 = int_to_ptr.vmem [resolvable:$true] %s48_s22  ;;  %s71_s25 = int_to_ptr.hbm [resolvable:$true] %s70_s25 }
   0xf   :  { %51 = dma.hbm_to_vmem [thread:$0]  %s47_s20, 32, %s49_s22, [#allocation6]  }
  0x10   :  { %s80_s27 = sshll.u32 %s2224_s5, 4  ;;  %s2138_s28 = smov [#allocation10]   ;;  %s81_s27 = int_to_ptr.hbm [resolvable:$true] %s80_s27 }
  0x11   :  { %s72_s29 = sshll.u32 %s2138_s28, 4  ;;  %s2139_s2 = smov [#allocation11]   ;;  %s73_s29 = int_to_ptr.vmem [resolvable:$true] %s72_s29 }
  0x12   :  { %75 = dma.hbm_to_vmem [thread:$0]  %s71_s25, 48, %s73_s29, [#allocation9]  }
  0x13   :  { %s82_s30 = sshll.u32 %s2139_s2, 4  ;;  %s83_s30 = int_to_ptr.vmem [resolvable:$true] %s82_s30 }
  0x14   :  { %88 = dma.hbm_to_vmem [thread:$0]  %s81_s27, 9216, %s83_s30, [#allocation12], %s2134_s13, %s2134_s13, %s2135_s14  }
  0x15   :  { %2120 = dma.done.wait [#allocation3], 128  }
  0x16   :  { %2121 = vsyncadd [#allocation3], 4294967168 }
  0x17   :  { %2122 = dma.done.wait [#allocation6], 1696  }
  0x18   :  { %2123 = vsyncadd [#allocation6], 4294965600 }
  0x19   :  { %2124 = dma.done.wait [#allocation9], 6192  }
  0x1a   :  { %2125 = vsyncadd [#allocation9], 4294961104 }
  0x1b   :  { %2126 = dma.done.wait [#allocation12], 9216  }
  0x1c   :  { %2127 = vsyncadd [#allocation12], 4294958080  ;;  %v130_v0 = vld [vmem:[#allocation5 + $0x60] sm:$0x33]  ;;  %vm206_vm0 = vcmask 1041408   ;;  %v116_v23 = vld [vmem:[#allocation2] sm:$0xff] }
  0x1d   :  { %v174_v1 = vunpack.c.l.b16 %v130_v0  ;;  %v1321_v3 = vld [vmem:[#allocation5 + $0x50] sm:$0xf]  ;;  %v1820_v4 = vld [vmem:[#allocation5 + $0x54] sm:$0xf0]  ;;  %v1313_v7 = vld [vmem:[#allocation5 + $0x40] sm:$0xf]  ;;  %v175_v18 = vunpack.c.h.b16 %v130_v0  ;;  %v2201_v34 = vpack.c.bf16 %v116_v23, %v116_v23 }
  0x1e   :  { %v1322_v6 = vor.u32 %v1820_v4, %v1321_v3  ;;  %v1818_v8 = vld [vmem:[#allocation5 + $0x44] sm:$0xf0]  ;;  %v1305_v10 = vld [vmem:[#allocation5 + $0x30] sm:$0xf]  ;;  %v1816_v11 = vld [vmem:[#allocation5 + $0x34] sm:$0xf0] }
  0x1f   :  { %v188_v2 = vpack.c.b16 %v174_v1, %v174_v1  ;;  %v1314_v9 = vor.u32 %v1818_v8, %v1313_v7  ;;  %v1306_v12 = vor.u32 %v1816_v11, %v1305_v10  ;;  %v1297_v13 = vld [vmem:[#allocation5 + $0x20] sm:$0xf]  ;;  %v1814_v14 = vld [vmem:[#allocation5 + $0x24] sm:$0xf0]  ;;  %v1289_v16 = vld [vmem:[#allocation5 + $0x10] sm:$0xf]  ;;  %v189_v22 = vpack.c.b16 %v175_v18, %v175_v18 }
  0x20   :  { %v1298_v15 = vor.u32 %v1814_v14, %v1297_v13  ;;  %v1812_v17 = vld [vmem:[#allocation5 + $0x14] sm:$0xf0]  ;;  %v1281_v20 = vld [vmem:[#allocation5] sm:$0xf]  ;;  %v1810_v21 = vld [vmem:[#allocation5 + $0x4] sm:$0xf0] }
  0x21   :  { %v208_v5 = vsel %vm206_vm0, %v188_v2, 0  ;;  %v1290_v19 = vor.u32 %v1812_v17, %v1289_v16  ;;  %v1282_v24 = vor.u32 %v1810_v21, %v1281_v20  ;;  %v1415_v25 = vld [vmem:[#allocation8 + $0xa8] sm:$0xf]  ;;  %v1843_v26 = vld [vmem:[#allocation8 + $0xb0] sm:$0xf0]  ;;  %v211_v31 = vsel %vm206_vm0, %v189_v22, 0 }
  0x22   :  { %214 = vmatpush.bf16.msra.mxu1 %v208_v5  ;;  %v1403_v27 = vld [vmem:[#allocation8 + $0x90] sm:$0xf]  ;;  %v1819_v28 = vld [vmem:[#allocation5 + $0x54] sm:$0xf]  ;;  %v1416_v29 = vor.u32 %v1843_v26, %v1415_v25  ;;  %v1840_v30 = vld [vmem:[#allocation8 + $0x98] sm:$0xf0] }
  0x23   :  { %v1323_v32 = vld [vmem:[#allocation5 + $0x58] sm:$0xf0]  ;;  %v1842_v33 = vld [vmem:[#allocation8 + $0xac] sm:$0xf]  ;;  %vm202_vm1 = vcmask 818176   ;;  %v1404_v35 = vor.u32 %v1840_v30, %v1403_v27  ;;  %s1266_s11 = sshll.u32 %s2226_s7, 4  ;;  %s1267_s11 = int_to_ptr.hbm [resolvable:$true] %s1266_s11 }
  0x24   :  { %569 = vmatpush.bf16.msra.mxu2 %v1416_v29  ;;  %v1391_v36 = vld [vmem:[#allocation8 + $0x78] sm:$0xf]  ;;  %v1837_v38 = vld [vmem:[#allocation8 + $0x80] sm:$0xf0]  ;;  %v1839_v40 = vld [vmem:[#allocation8 + $0x94] sm:$0xf]  ;;  %v1326_v42 = vor.u32 %v1819_v28, %v1323_v32 }
  0x25   :  { %v1417_v37 = vld [vmem:[#allocation8 + $0xb4] sm:$0xf0]  ;;  %v1405_v41 = vld [vmem:[#allocation8 + $0x9c] sm:$0xf0]  ;;  %v1511_v46 = vld [vmem:[#allocation8 + $0x168] sm:$0xf]  ;;  %v1392_v47 = vor.u32 %v1837_v38, %v1391_v36 }
  0x26   :  { %215 = vmatpush.bf16.msra.mxu1 %v1322_v6  ;;  %v1420_v39 = vor.u32 %v1842_v33, %v1417_v37  ;;  %v1817_v43 = vld [vmem:[#allocation5 + $0x44] sm:$0xf]  ;;  %v1315_v44 = vld [vmem:[#allocation5 + $0x48] sm:$0xf0]  ;;  %v1408_v45 = vor.u32 %v1839_v40, %v1405_v41  ;;  %v1393_v49 = vld [vmem:[#allocation8 + $0x84] sm:$0xf0] }
  0x27   :  { %v1836_v48 = vld [vmem:[#allocation8 + $0x7c] sm:$0xf]  ;;  %v1867_v50 = vld [vmem:[#allocation8 + $0x170] sm:$0xf0]  ;;  %v1379_v51 = vld [vmem:[#allocation8 + $0x60] sm:$0xf]  ;;  %v1318_v55 = vor.u32 %v1817_v43, %v1315_v44 }
  0x28   :  { %595 = vmatpush.bf16.msra.mxu0 %v1420_v39  ;;  %570 = vmatpush.bf16.msra.mxu2 %v1404_v35  ;;  %v1834_v52 = vld [vmem:[#allocation8 + $0x68] sm:$0xf0]  ;;  %v1512_v53 = vor.u32 %v1867_v50, %v1511_v46  ;;  %v1499_v54 = vld [vmem:[#allocation8 + $0x150] sm:$0xf]  ;;  %v1864_v56 = vld [vmem:[#allocation8 + $0x158] sm:$0xf0]  ;;  %v1396_v59 = vor.u32 %v1836_v48, %v1393_v49 }
  0x29   :  { %v1815_v57 = vld [vmem:[#allocation5 + $0x34] sm:$0xf]  ;;  %v1307_v58 = vld [vmem:[#allocation5 + $0x38] sm:$0xf0]  ;;  %v1833_v60 = vld [vmem:[#allocation8 + $0x64] sm:$0xf]  ;;  %v1500_v61 = vor.u32 %v1864_v56, %v1499_v54  ;;  %v1380_v62 = vor.u32 %v1834_v52, %v1379_v51 }
  0x2a   :  { %216 = vmatpush.bf16.msra.mxu1 %v1314_v9  ;;  %582 = vmatpush.bf16.msra.mxu3 %v1512_v53  ;;  %v1381_v63 = vld [vmem:[#allocation8 + $0x6c] sm:$0xf0]  ;;  %v1487_v0 = vld [vmem:[#allocation8 + $0x138] sm:$0xf]  ;;  %v1861_v1 = vld [vmem:[#allocation8 + $0x140] sm:$0xf0]  ;;  %v1310_v4 = vor.u32 %v1815_v57, %v1307_v58 }
  0x2b   :  { %v1367_v2 = vld [vmem:[#allocation8 + $0x48] sm:$0xf]  ;;  %v1831_v3 = vld [vmem:[#allocation8 + $0x50] sm:$0xf0]  ;;  %v1813_v5 = vld [vmem:[#allocation5 + $0x24] sm:$0xf]  ;;  %v1384_v7 = vor.u32 %v1833_v60, %v1381_v63  ;;  %v1488_v9 = vor.u32 %v1861_v1, %v1487_v0 }
  0x2c   :  { %596 = vmatpush.bf16.msra.mxu0 %v1408_v45  ;;  %571 = vmatpush.bf16.msra.mxu2 %v1392_v47  ;;  %v1299_v6 = vld [vmem:[#allocation5 + $0x28] sm:$0xf0]  ;;  %v1830_v8 = vld [vmem:[#allocation8 + $0x4c] sm:$0xf]  ;;  %v1368_v10 = vor.u32 %v1831_v3, %v1367_v2  ;;  %v1369_v11 = vld [vmem:[#allocation8 + $0x54] sm:$0xf0] }
  0x2d   :  { %v1858_v13 = vld [vmem:[#allocation8 + $0x128] sm:$0xf0]  ;;  %v1355_v14 = vld [vmem:[#allocation8 + $0x30] sm:$0xf]  ;;  %v1302_v16 = vor.u32 %v1813_v5, %v1299_v6  ;;  %v1827_v22 = vld [vmem:[#allocation8 + $0x34] sm:$0xf] }
  0x2e   :  { %217 = vmatpush.bf16.msra.mxu1 %v1306_v12  ;;  %583 = vmatpush.bf16.msra.mxu3 %v1500_v61  ;;  %v1475_v12 = vld [vmem:[#allocation8 + $0x120] sm:$0xf]  ;;  %v1811_v17 = vld [vmem:[#allocation5 + $0x14] sm:$0xf]  ;;  %v1291_v18 = vld [vmem:[#allocation5 + $0x18] sm:$0xf0] }
  0x2f   :  { %v1476_v20 = vor.u32 %v1858_v13, %v1475_v12  ;;  %v1357_v23 = vld [vmem:[#allocation8 + $0x3c] sm:$0xf0]  ;;  %v1825_v25 = vld [vmem:[#allocation8 + $0x20] sm:$0xf0]  ;;  %v1294_v26 = vor.u32 %v1811_v17, %v1291_v18  ;;  %v1809_v27 = vld [vmem:[#allocation5 + $0x4] sm:$0xf] }
  0x30   :  { %597 = vmatpush.bf16.msra.mxu0 %v1396_v59  ;;  %572 = vmatpush.bf16.msra.mxu2 %v1380_v62  ;;  %v1283_v28 = vld [vmem:[#allocation5 + $0x8] sm:$0xf0]  ;;  %v1360_v29 = vor.u32 %v1827_v22, %v1357_v23  ;;  %v1824_v30 = vld [vmem:[#allocation8 + $0x1c] sm:$0xf]  ;;  %v1345_v32 = vld [vmem:[#allocation8 + $0x24] sm:$0xf0] }
  0x31   :  { %v1866_v33 = vld [vmem:[#allocation8 + $0x16c] sm:$0xf]  ;;  %v1513_v35 = vld [vmem:[#allocation8 + $0x174] sm:$0xf0]  ;;  %v1331_v36 = vld [vmem:[#allocation8] sm:$0xf]  ;;  %v1286_v38 = vor.u32 %v1809_v27, %v1283_v28  ;;  %v1348_v41 = vor.u32 %v1824_v30, %v1345_v32 }
  0x32   :  { %218 = vmatpush.bf16.msra.mxu1 %v1298_v15  ;;  %v1828_v15 = vld [vmem:[#allocation8 + $0x38] sm:$0xf0]  ;;  %584 = vmatpush.bf16.msra.mxu3 %v1488_v9  ;;  %v1822_v37 = vld [vmem:[#allocation8 + $0x8] sm:$0xf0]  ;;  %v1423_v39 = vld [vmem:[#allocation8 + $0xb0] sm:$0xf] }
  0x33   :  { %v1356_v21 = vor.u32 %v1828_v15, %v1355_v14  ;;  %v1844_v40 = vld [vmem:[#allocation8 + $0xb8] sm:$0xf0]  ;;  %v1332_v43 = vor.u32 %v1822_v37, %v1331_v36  ;;  %v1411_v45 = vld [vmem:[#allocation8 + $0x98] sm:$0xf]  ;;  %v1841_v46 = vld [vmem:[#allocation8 + $0xa0] sm:$0xf0] }
  0x34   :  { %598 = vmatpush.bf16.msra.mxu0 %v1384_v7  ;;  %573 = vmatpush.bf16.msra.mxu2 %v1368_v10  ;;  %v1424_v44 = vor.u32 %v1844_v40, %v1423_v39  ;;  %v1412_v47 = vor.u32 %v1841_v46, %v1411_v45  ;;  %v1399_v48 = vld [vmem:[#allocation8 + $0x80] sm:$0xf]  ;;  %v1838_v49 = vld [vmem:[#allocation8 + $0x88] sm:$0xf0]  ;;  %v1463_v51 = vld [vmem:[#allocation8 + $0x108] sm:$0xf] }
  0x35   :  { %v1400_v50 = vor.u32 %v1838_v49, %v1399_v48  ;;  %v1855_v52 = vld [vmem:[#allocation8 + $0x110] sm:$0xf0]  ;;  %v1387_v53 = vld [vmem:[#allocation8 + $0x68] sm:$0xf]  ;;  %v1821_v56 = vld [vmem:[#allocation8 + $0x4] sm:$0xf] }
  0x36   :  { %219 = vmatpush.bf16.msra.mxu1 %v1290_v19  ;;  %v1372_v19 = vor.u32 %v1830_v8, %v1369_v11  ;;  %585 = vmatpush.bf16.msra.mxu3 %v1476_v20  ;;  %v1464_v54 = vor.u32 %v1855_v52, %v1463_v51  ;;  %v1333_v57 = vld [vmem:[#allocation8 + $0xc] sm:$0xf0]  ;;  %v1863_v60 = vld [vmem:[#allocation8 + $0x154] sm:$0xf]  ;;  %v1501_v61 = vld [vmem:[#allocation8 + $0x15c] sm:$0xf0] }
  0x37   :  { %v1336_v59 = vor.u32 %v1821_v56, %v1333_v57  ;;  %v1451_v62 = vld [vmem:[#allocation8 + $0xf0] sm:$0xf]  ;;  %v1852_v63 = vld [vmem:[#allocation8 + $0xf8] sm:$0xf0]  ;;  %v1439_v7 = vld [vmem:[#allocation8 + $0xd8] sm:$0xf] }
  0x38   :  { %599 = vmatpush.bf16.msra.mxu0 %v1372_v19  ;;  %574 = vmatpush.bf16.msra.mxu2 %v1356_v21  ;;  %v1375_v0 = vld [vmem:[#allocation8 + $0x50] sm:$0xf]  ;;  %v1452_v1 = vor.u32 %v1852_v63, %v1451_v62  ;;  %v1832_v2 = vld [vmem:[#allocation8 + $0x58] sm:$0xf0]  ;;  %v1849_v8 = vld [vmem:[#allocation8 + $0xe0] sm:$0xf0] }
  0x39   :  { %v1860_v3 = vld [vmem:[#allocation8 + $0x13c] sm:$0xf]  ;;  %v1376_v5 = vor.u32 %v1832_v2, %v1375_v0  ;;  %v1363_v9 = vld [vmem:[#allocation8 + $0x38] sm:$0xf]  ;;  %v1440_v10 = vor.u32 %v1849_v8, %v1439_v7  ;;  %v1829_v11 = vld [vmem:[#allocation8 + $0x40] sm:$0xf0] }
  0x3a   :  { %220 = vmatpush.bf16.msra.mxu1 %v1282_v24  ;;  %v1343_v24 = vld [vmem:[#allocation8 + $0x18] sm:$0xf]  ;;  %586 = vmatpush.bf16.msra.mxu3 %v1464_v54  ;;  %v1857_v12 = vld [vmem:[#allocation8 + $0x124] sm:$0xf]  ;;  %v1477_v13 = vld [vmem:[#allocation8 + $0x12c] sm:$0xf0]  ;;  %v1364_v14 = vor.u32 %v1829_v11, %v1363_v9 }
  0x3b   :  { %v1480_v15 = vor.u32 %v1857_v12, %v1477_v13  ;;  %v1846_v17 = vld [vmem:[#allocation8 + $0xc8] sm:$0xf0]  ;;  %v1351_v18 = vld [vmem:[#allocation8 + $0x20] sm:$0xf]  ;;  %v1465_v22 = vld [vmem:[#allocation8 + $0x114] sm:$0xf0] }
  0x3c   :  { %600 = vmatpush.bf16.msra.mxu0 %v1360_v29  ;;  %v1826_v20 = vld [vmem:[#allocation8 + $0x28] sm:$0xf0]  ;;  %v1339_v28 = vld [vmem:[#allocation8 + $0x8] sm:$0xf]  ;;  %v1823_v29 = vld [vmem:[#allocation8 + $0x10] sm:$0xf0] }
  0x3d   :  { %1327 = vmatmul.msk.bf16.vlgmr.msra.gmra.mxu1 %vm202_vm1, %v2201_v34  ;;  %v1854_v21 = vld [vmem:[#allocation8 + $0x10c] sm:$0xf]  ;;  %v1352_v23 = vor.u32 %v1826_v20, %v1351_v18  ;;  %v1851_v30 = vld [vmem:[#allocation8 + $0xf4] sm:$0xf]  ;;  %v1507_v32 = vld [vmem:[#allocation8 + $0x158] sm:$0xf] }
  0x3e   :  { %227 = vmatpush.bf16.msrb.mxu1 %v211_v31  ;;  %v1344_v31 = vor.u32 %v1825_v25, %v1343_v24  ;;  %587 = vmatpush.bf16.msra.mxu3 %v1452_v1  ;;  %v1519_v24 = vld [vmem:[#allocation8 + $0x170] sm:$0xf]  ;;  %v1868_v25 = vld [vmem:[#allocation8 + $0x178] sm:$0xf0]  ;;  %v1441_v39 = vld [vmem:[#allocation8 + $0xe4] sm:$0xf0] }
  0x3f   :  { %v1520_v27 = vor.u32 %v1868_v25, %v1519_v24  ;;  %v1495_v40 = vld [vmem:[#allocation8 + $0x140] sm:$0xf]  ;;  %v1429_v45 = vld [vmem:[#allocation8 + $0xcc] sm:$0xf0]  ;;  %v1483_v46 = vld [vmem:[#allocation8 + $0x128] sm:$0xf] }
  0x40   :  { %575 = vmatpush.bf16.msra.mxu2 %v1344_v31  ;;  %601 = vmatpush.bf16.msra.mxu0 %v1348_v41  ;;  %v1453_v31 = vld [vmem:[#allocation8 + $0xfc] sm:$0xf0]  ;;  %v1859_v48 = vld [vmem:[#allocation8 + $0x130] sm:$0xf0]  ;;  %v131_v49 = vld [vmem:[#allocation7] sm:$0x3] }
  0x41   :  { %v1456_v37 = vor.u32 %v1851_v30, %v1453_v31  ;;  %v1471_v51 = vld [vmem:[#allocation8 + $0x110] sm:$0xf]  ;;  %v1856_v52 = vld [vmem:[#allocation8 + $0x118] sm:$0xf0]  ;;  %v1459_v56 = vld [vmem:[#allocation8 + $0xf8] sm:$0xf] }
  0x42   :  { %228 = vmatpush.bf16.msrb.mxu1 %v1326_v42  ;;  %v1516_v42 = vor.u32 %v1866_v33, %v1513_v35  ;;  %588 = vmatpush.bf16.msra.mxu3 %v1440_v10  ;;  %v1865_v33 = vld [vmem:[#allocation8 + $0x160] sm:$0xf0]  ;;  %v1340_v35 = vor.u32 %v1823_v29, %v1339_v28  ;;  %v1472_v54 = vor.u32 %v1856_v52, %v1471_v51  ;;  %v1435_v63 = vld [vmem:[#allocation8 + $0xc8] sm:$0xf]  ;;  %v1847_v0 = vld [vmem:[#allocation8 + $0xd0] sm:$0xf0] }
  0x43   :  { %v1508_v36 = vor.u32 %v1865_v33, %v1507_v32  ;;  %v1853_v57 = vld [vmem:[#allocation8 + $0x100] sm:$0xf0]  ;;  %v1436_v2 = vor.u32 %v1847_v0, %v1435_v63  ;;  %v1888_v7 = vld [vmem:[#allocation11 + $0x98] sm:$0xf0]  ;;  %v1703_v8 = vld [vmem:[#allocation11 + $0x168] sm:$0xf] }
  0x44   :  { %576 = vmatpush.bf16.msra.mxu2 %v1332_v43  ;;  %602 = vmatpush.bf16.msra.mxu0 %v1336_v59  ;;  %v1460_v59 = vor.u32 %v1853_v57, %v1459_v56  ;;  %v1915_v10 = vld [vmem:[#allocation11 + $0x170] sm:$0xf0]  ;;  %v1583_v11 = vld [vmem:[#allocation11 + $0x78] sm:$0xf]  ;;  %v1885_v12 = vld [vmem:[#allocation11 + $0x80] sm:$0xf0] }
  0x45   :  { %v1704_v13 = vor.u32 %v1915_v10, %v1703_v8  ;;  %v1679_v18 = vld [vmem:[#allocation11 + $0x138] sm:$0xf]  ;;  %v134_v20 = vperm.slane %v131_v49, 1  ;;  %v1559_v29 = vld [vmem:[#allocation11 + $0x48] sm:$0xf]  ;;  %vm1257_vm2 = vcmask 850944  }
  0x46   :  { %229 = vmatpush.bf16.msrb.mxu1 %v1318_v55  ;;  %v1835_v55 = vld [vmem:[#allocation8 + $0x70] sm:$0xf0]  ;;  %v1609_v24 = vld [vmem:[#allocation11 + $0xb4] sm:$0xf0]  ;;  %v1879_v30 = vld [vmem:[#allocation11 + $0x50] sm:$0xf0] }
  0x47   :  { %v1388_v58 = vor.u32 %v1835_v55, %v1387_v53  ;;  %v133_v53 = vperm.slane %v131_v49, 0  ;;  %v1887_v33 = vld [vmem:[#allocation11 + $0x94] sm:$0xf]  ;;  %v1906_v49 = vld [vmem:[#allocation11 + $0x128] sm:$0xf0] }
  0x48   :  { %621 = vmatpush.bf16.msrb.mxu2 %v1424_v44  ;;  %v1845_v44 = vld [vmem:[#allocation8 + $0xc4] sm:$0xf]  ;;  %v1573_v52 = vld [vmem:[#allocation11 + $0x6c] sm:$0xf0]  ;;  %v1655_v57 = vld [vmem:[#allocation11 + $0x108] sm:$0xf] }
  0x49   :  { %v1936_v8 = vld [vmem:[#allocation11 + $0x218] sm:$0xf0]  ;;  %v1549_v10 = vld [vmem:[#allocation11 + $0x3c] sm:$0xf0] }
  0x4a   :  { %230 = vmatpush.bf16.msrb.mxu1 %v1310_v4  ;;  %v1489_v4 = vld [vmem:[#allocation8 + $0x144] sm:$0xf0] }
  0x4b   :  { %v1492_v6 = vor.u32 %v1860_v3, %v1489_v4  ;;  %v1607_v3 = vld [vmem:[#allocation11 + $0xa8] sm:$0xf]  ;;  %v1891_v4 = vld [vmem:[#allocation11 + $0xb0] sm:$0xf0] }
  0x4c   :  { %622 = vmatpush.bf16.msrb.mxu2 %v1412_v47  ;;  %v1432_v47 = vor.u32 %v1845_v44, %v1429_v45  ;;  %v1535_v45 = vld [vmem:[#allocation11 + $0x18] sm:$0xf] }
  0x4e   :  { %231 = vmatpush.bf16.msrb.mxu1 %v1302_v16  ;;  %v1427_v16 = vld [vmem:[#allocation8 + $0xc0] sm:$0xf] }
  0x4f   :  { %v1428_v19 = vor.u32 %v1846_v17, %v1427_v16  ;;  %v1584_v17 = vor.u32 %v1885_v12, %v1583_v11 }
  0x50   :  { %623 = vmatpush.bf16.msrb.mxu2 %v1400_v50  ;;  %v1484_v50 = vor.u32 %v1859_v48, %v1483_v46  ;;  %v1873_v46 = vld [vmem:[#allocation11 + $0x20] sm:$0xf0]  ;;  %v1667_v48 = vld [vmem:[#allocation11 + $0x120] sm:$0xf] }
  0x51   :  { %589 = vmatpush.bf16.msra.mxu3 %v1428_v19  ;;  %v1909_v19 = vld [vmem:[#allocation11 + $0x140] sm:$0xf0]  ;;  %v1668_v51 = vor.u32 %v1906_v49, %v1667_v48  ;;  %v1927_v48 = vld [vmem:[#allocation11 + $0x1d0] sm:$0xf0]  ;;  %v1902_v49 = vld [vmem:[#allocation11 + $0x10c] sm:$0xf] }
  0x52   :  { %232 = vmatpush.bf16.msrb.mxu1 %v1294_v26  ;;  %v1468_v26 = vor.u32 %v1854_v21, %v1465_v22  ;;  %v1571_v21 = vld [vmem:[#allocation11 + $0x60] sm:$0xf]  ;;  %v1882_v22 = vld [vmem:[#allocation11 + $0x68] sm:$0xf0]  ;;  %v1680_v25 = vor.u32 %v1909_v19, %v1679_v18  ;;  %v1775_v18 = vld [vmem:[#allocation11 + $0x1f8] sm:$0xf] }
  0x54   :  { %624 = vmatpush.bf16.msrb.mxu2 %v1388_v58 }
  0x55   :  { %634 = vmatpush.bf16.msrb.mxu3 %v1520_v27  ;;  %v1572_v27 = vor.u32 %v1882_v22, %v1571_v21  ;;  %v1872_v21 = vld [vmem:[#allocation11 + $0x1c] sm:$0xf]  ;;  %v1537_v22 = vld [vmem:[#allocation11 + $0x24] sm:$0xf0] }
  0x56   :  { %233 = vmatpush.bf16.msrb.mxu1 %v1286_v38  ;;  %v1848_v38 = vld [vmem:[#allocation8 + $0xdc] sm:$0xf] }
  0x57   :  { %v1444_v41 = vor.u32 %v1848_v38, %v1441_v39  ;;  %v1876_v38 = vld [vmem:[#allocation11 + $0x38] sm:$0xf0] }
  0x58   :  { %625 = vmatpush.bf16.msrb.mxu2 %v1376_v5  ;;  %v1595_v5 = vld [vmem:[#allocation11 + $0x90] sm:$0xf] }
  0x59   :  { %1328 = vmatmul.msk.bf16.vlgmr.msrb.gmra.mxu1 %vm202_vm1, %v2201_v34  ;;  %v1504_v34 = vor.u32 %v1863_v60, %v1501_v61  ;;  %635 = vmatpush.bf16.msrb.mxu3 %v1508_v36  ;;  %v1447_v60 = vld [vmem:[#allocation8 + $0xe0] sm:$0xf]  ;;  %v1850_v61 = vld [vmem:[#allocation8 + $0xe8] sm:$0xf0]  ;;  %v1596_v9 = vor.u32 %v1888_v7, %v1595_v5  ;;  %v1560_v36 = vor.u32 %v1879_v30, %v1559_v29  ;;  %v1894_v29 = vld [vmem:[#allocation11 + $0xc8] sm:$0xf0] }
  0x5a   :  { %608 = vmatpush.bf16.msra.mxu1 %v1516_v42  ;;  %v1862_v42 = vld [vmem:[#allocation8 + $0x148] sm:$0xf0]  ;;  %v1448_v62 = vor.u32 %v1850_v61, %v1447_v60  ;;  %v1939_v61 = vld [vmem:[#allocation11 + $0x230] sm:$0xf0]  ;;  %v1900_v5 = vld [vmem:[#allocation11 + $0xf8] sm:$0xf0] }
  0x5b   :  { %v1496_v43 = vor.u32 %v1862_v42, %v1495_v40  ;;  %v1884_v40 = vld [vmem:[#allocation11 + $0x7c] sm:$0xf]  ;;  %v1763_v30 = vld [vmem:[#allocation11 + $0x1e0] sm:$0xf] }
  0x5c   :  { %626 = vmatpush.bf16.msrb.mxu2 %v1364_v14  ;;  %v1691_v14 = vld [vmem:[#allocation11 + $0x150] sm:$0xf] }
  0x5d   :  { %636 = vmatpush.bf16.msrb.mxu3 %v1496_v43 }
  0x5e   :  { %609 = vmatpush.bf16.msra.mxu1 %v1504_v34 }
  0x60   :  { %627 = vmatpush.bf16.msrb.mxu2 %v1352_v23  ;;  %v1890_v23 = vld [vmem:[#allocation11 + $0xac] sm:$0xf] }
  0x61   :  { %637 = vmatpush.bf16.msrb.mxu3 %v1484_v50  ;;  %v1612_v31 = vor.u32 %v1890_v23, %v1609_v24  ;;  %v1881_v50 = vld [vmem:[#allocation11 + $0x64] sm:$0xf]  ;;  %v1540_v24 = vor.u32 %v1872_v21, %v1537_v22 }
  0x62   :  { %610 = vmatpush.bf16.msra.mxu1 %v1492_v6  ;;  %v1608_v6 = vor.u32 %v1891_v4, %v1607_v3  ;;  %v1643_v4 = vld [vmem:[#allocation11 + $0xf0] sm:$0xf]  ;;  %v1893_v21 = vld [vmem:[#allocation11 + $0xc4] sm:$0xf] }
  0x63   :  { %v1644_v7 = vor.u32 %v1900_v5, %v1643_v4  ;;  %v1910_v4 = vld [vmem:[#allocation11 + $0x148] sm:$0xf0] }
  0x64   :  { %628 = vmatpush.bf16.msrb.mxu2 %v1340_v35  ;;  %1138 = vmatpush.bf16.msrb.mxu0 %v1608_v6  ;;  %v1597_v35 = vld [vmem:[#allocation11 + $0x9c] sm:$0xf0]  ;;  %v1787_v6 = vld [vmem:[#allocation11 + $0x210] sm:$0xf] }
  0x65   :  { %638 = vmatpush.bf16.msrb.mxu3 %v1472_v54  ;;  %v1600_v39 = vor.u32 %v1887_v33, %v1597_v35  ;;  %v1523_v54 = vld [vmem:[#allocation11] sm:$0xf]  ;;  %v1788_v11 = vor.u32 %v1936_v8, %v1787_v6  ;;  %v1869_v35 = vld [vmem:[#allocation11 + $0x4] sm:$0xf]  ;;  %v1727_v6 = vld [vmem:[#allocation11 + $0x198] sm:$0xf] }
  0x66   :  { %611 = vmatpush.bf16.msra.mxu1 %v1480_v15  ;;  %v1912_v15 = vld [vmem:[#allocation11 + $0x158] sm:$0xf0] }
  0x67   :  { %v1692_v16 = vor.u32 %v1912_v15, %v1691_v14  ;;  %v1693_v14 = vld [vmem:[#allocation11 + $0x15c] sm:$0xf0]  ;;  %v1896_v8 = vld [vmem:[#allocation11 + $0xdc] sm:$0xf] }
  0x68   :  { %1139 = vmatpush.bf16.msrb.mxu0 %v1596_v9  ;;  %v1875_v9 = vld [vmem:[#allocation11 + $0x34] sm:$0xf] }
  0x69   :  { %639 = vmatpush.bf16.msrb.mxu3 %v1460_v59  ;;  %v1799_v59 = vld [vmem:[#allocation11 + $0x228] sm:$0xf]  ;;  %v1552_v12 = vor.u32 %v1875_v9, %v1549_v10 }
  0x6a   :  { %612 = vmatpush.bf16.msra.mxu1 %v1468_v26  ;;  %v1800_v63 = vor.u32 %v1939_v61, %v1799_v59  ;;  %v1739_v59 = vld [vmem:[#allocation11 + $0x1b0] sm:$0xf]  ;;  %v1899_v61 = vld [vmem:[#allocation11 + $0xf4] sm:$0xf]  ;;  %v1633_v10 = vld [vmem:[#allocation11 + $0xe4] sm:$0xf0] }
  0x6c   :  { %1140 = vmatpush.bf16.msrb.mxu0 %v1584_v17  ;;  %v1897_v17 = vld [vmem:[#allocation11 + $0xe0] sm:$0xf0] }
  0x6d   :  { %640 = vmatpush.bf16.msrb.mxu3 %v1448_v62  ;;  %v1561_v62 = vld [vmem:[#allocation11 + $0x54] sm:$0xf0] }
  0x6e   :  { %613 = vmatpush.bf16.msra.mxu1 %v1456_v37  ;;  %v1547_v37 = vld [vmem:[#allocation11 + $0x30] sm:$0xf] }
  0x6f   :  { %v1548_v43 = vor.u32 %v1876_v38, %v1547_v37  ;;  %v1905_v37 = vld [vmem:[#allocation11 + $0x124] sm:$0xf] }
  0x70   :  { %1141 = vmatpush.bf16.msrb.mxu0 %v1572_v27  ;;  %v1619_v27 = vld [vmem:[#allocation11 + $0xc0] sm:$0xf] }
  0x71   :  { %641 = vmatpush.bf16.msrb.mxu3 %v1436_v2  ;;  %v1705_v2 = vld [vmem:[#allocation11 + $0x174] sm:$0xf0] }
  0x72   :  { %614 = vmatpush.bf16.msra.mxu1 %v1444_v41  ;;  %v1585_v41 = vld [vmem:[#allocation11 + $0x84] sm:$0xf0] }
  0x73   :  { %v1588_v44 = vor.u32 %v1884_v40, %v1585_v41  ;;  %v1938_v40 = vld [vmem:[#allocation11 + $0x22c] sm:$0xf]  ;;  %v1801_v41 = vld [vmem:[#allocation11 + $0x234] sm:$0xf0] }
  0x74   :  { %1142 = vmatpush.bf16.msrb.mxu0 %v1560_v36  ;;  %v1525_v36 = vld [vmem:[#allocation11 + $0xc] sm:$0xf0] }
  0x75   :  { %v1528_v38 = vor.u32 %v1869_v35, %v1525_v36  ;;  %v1923_v36 = vld [vmem:[#allocation11 + $0x1b4] sm:$0xf] }
  0x76   :  { %615 = vmatpush.bf16.msra.mxu1 %v1432_v47  ;;  %v1536_v47 = vor.u32 %v1873_v46, %v1535_v45  ;;  %v1916_v45 = vld [vmem:[#allocation11 + $0x178] sm:$0xf0] }
  0x78   :  { %1143 = vmatpush.bf16.msrb.mxu0 %v1548_v43  ;;  %v1804_v43 = vor.u32 %v1938_v40, %v1801_v41  ;;  %v1889_v40 = vld [vmem:[#allocation11 + $0xa0] sm:$0xf0]  ;;  %v1651_v41 = vld [vmem:[#allocation11 + $0xf8] sm:$0xf] }
  0x7a   :  { %1151 = vmatpush.bf16.msrb.mxu1 %v1704_v13  ;;  %v1911_v13 = vld [vmem:[#allocation11 + $0x154] sm:$0xf] }
  0x7b   :  { %v1696_v15 = vor.u32 %v1911_v13, %v1693_v14  ;;  %v1636_v13 = vor.u32 %v1896_v8, %v1633_v10 }
  0x7c   :  { %1144 = vmatpush.bf16.msrb.mxu0 %v1536_v47  ;;  %v1751_v47 = vld [vmem:[#allocation11 + $0x1c8] sm:$0xf] }
  0x7e   :  { %1152 = vmatpush.bf16.msrb.mxu1 %v1692_v16  ;;  %v1631_v16 = vld [vmem:[#allocation11 + $0xd8] sm:$0xf] }
  0x7f   :  { %v1632_v19 = vor.u32 %v1897_v17, %v1631_v16  ;;  %v1907_v16 = vld [vmem:[#allocation11 + $0x130] sm:$0xf0] }
  0x82   :  { %1153 = vmatpush.bf16.msrb.mxu1 %v1680_v25  ;;  %v1908_v25 = vld [vmem:[#allocation11 + $0x13c] sm:$0xf] }
  0x86   :  { %1154 = vmatpush.bf16.msrb.mxu1 %v1668_v51  ;;  %v1657_v51 = vld [vmem:[#allocation11 + $0x114] sm:$0xf0] }
  0xba   :  { %v222_v55 = vpop.f32.mrf.mxu1 }
  0xbb   :  { %v223_v58 = vadd.f32 %v222_v55, %v133_v53  ;;  %v1576_v53 = vor.u32 %v1881_v50, %v1573_v52  ;;  %v1870_v55 = vld [vmem:[#allocation11 + $0x8] sm:$0xf0]  ;;  %v1752_v50 = vor.u32 %v1927_v48, %v1751_v47  ;;  %v1935_v52 = vld [vmem:[#allocation11 + $0x214] sm:$0xf]  ;;  %v1729_v47 = vld [vmem:[#allocation11 + $0x1a4] sm:$0xf0] }
  0xbc   :  { %v1524_v56 = vor.u32 %v1870_v55, %v1523_v54  ;;  %v1660_v54 = vor.u32 %v1902_v49, %v1657_v51  ;;  %v1591_v48 = vld [vmem:[#allocation11 + $0x80] sm:$0xf] }
  0xbd   :  { %v239_v34 = vpack.c.bf16 %v223_v58, %v223_v58  ;;  %v1903_v58 = vld [vmem:[#allocation11 + $0x110] sm:$0xf0]  ;;  %v1639_v51 = vld [vmem:[#allocation11 + $0xe0] sm:$0xf] }
  0xbe   :  { %v1656_v60 = vor.u32 %v1903_v58, %v1655_v57  ;;  %1145 = vmatpush.bf16.msrb.mxu0 %v1524_v56  ;;  %v1699_v56 = vld [vmem:[#allocation11 + $0x158] sm:$0xf]  ;;  %v1913_v57 = vld [vmem:[#allocation11 + $0x160] sm:$0xf0] }
  0xbf   :  { %577 = vmatmul.bf16.vlgmr.msra.gmra.mxu2 %v239_v34  ;;  %603 = vmatmul.bf16.vlgmr.msra.gmra.mxu0 %v239_v34  ;;  %v1700_v58 = vor.u32 %v1913_v57, %v1699_v56  ;;  %v1917_v56 = vld [vmem:[#allocation11 + $0x184] sm:$0xf]  ;;  %v1717_v57 = vld [vmem:[#allocation11 + $0x18c] sm:$0xf0] }
  0xc0   :  { %1155 = vmatpush.bf16.msrb.mxu1 %v1656_v60  ;;  %1164 = vmatpush.bf16.msra.mxu2 %v1800_v63  ;;  %v1924_v60 = vld [vmem:[#allocation11 + $0x1b8] sm:$0xf0] }
  0xc1   :  { %v1932_v63 = vld [vmem:[#allocation11 + $0x1fc] sm:$0xf] }
  0xc2   :  { %v224_v1 = vpop.f32.mrf.mxu1 }
  0xc3   :  { %v1914_v1 = vld [vmem:[#allocation11 + $0x16c] sm:$0xf] }
  0xc4   :  { %v1708_v3 = vor.u32 %v1914_v1, %v1705_v2  ;;  %1156 = vmatpush.bf16.msrb.mxu1 %v1644_v7  ;;  %1165 = vmatpush.bf16.msra.mxu2 %v1788_v11  ;;  %v1921_v7 = vld [vmem:[#allocation11 + $0x1a0] sm:$0xf0] }
  0xc5   :  { %v1728_v9 = vor.u32 %v1921_v7, %v1727_v6  ;;  %v1929_v11 = vld [vmem:[#allocation11 + $0x1e4] sm:$0xf]  ;;  %v1555_v6 = vld [vmem:[#allocation11 + $0x38] sm:$0xf] }
  0xc6   :  { %1190 = vmatpush.bf16.msra.mxu0 %v1708_v3  ;;  %v1687_v3 = vld [vmem:[#allocation11 + $0x140] sm:$0xf]  ;;  %v1877_v7 = vld [vmem:[#allocation11 + $0x40] sm:$0xf0] }
  0xc7   :  { %v1688_v5 = vor.u32 %v1910_v4, %v1687_v3 }
  0xc8   :  { %1157 = vmatpush.bf16.msrb.mxu1 %v1632_v19  ;;  %v1715_v19 = vld [vmem:[#allocation11 + $0x180] sm:$0xf] }
  0xca   :  { %1191 = vmatpush.bf16.msra.mxu0 %v1696_v15  ;;  %v1675_v15 = vld [vmem:[#allocation11 + $0x128] sm:$0xf] }
  0xcf   :  { %629 = vmatmul.bf16.vlgmr.msrb.gmra.mxu2 %v239_v34  ;;  %v1878_v34 = vld [vmem:[#allocation11 + $0x4c] sm:$0xf] }
  0xd0   :  { %v1564_v0 = vor.u32 %v1878_v34, %v1561_v62  ;;  %v1740_v34 = vor.u32 %v1924_v60, %v1739_v59  ;;  %v1645_v62 = vld [vmem:[#allocation11 + $0xfc] sm:$0xf0]  ;;  %v1720_v59 = vor.u32 %v1917_v56, %v1717_v57  ;;  %v1883_v60 = vld [vmem:[#allocation11 + $0x70] sm:$0xf0] }
  0xd1   :  { %v1648_v1 = vor.u32 %v1899_v61, %v1645_v62  ;;  %v1627_v61 = vld [vmem:[#allocation11 + $0xc8] sm:$0xf]  ;;  %v1919_v56 = vld [vmem:[#allocation11 + $0x190] sm:$0xf0] }
  0xd6   :  { %v235_v26 = vpop.f32.mrf.mxu1 }
  0xd7   :  { %v236_v28 = vadd.f32 %v235_v26, %v134_v20  ;;  %v1933_v20 = vld [vmem:[#allocation11 + $0x200] sm:$0xf0]  ;;  %v1681_v26 = vld [vmem:[#allocation11 + $0x144] sm:$0xf0] }
  0xd8   :  { %v1776_v23 = vor.u32 %v1933_v20, %v1775_v18  ;;  %v1676_v18 = vor.u32 %v1907_v16, %v1675_v15  ;;  %v1918_v20 = vld [vmem:[#allocation11 + $0x188] sm:$0xf0] }
  0xd9   :  { %v240_v32 = vpack.c.bf16 %v236_v28, %v236_v28  ;;  %v1684_v28 = vor.u32 %v1908_v25, %v1681_v26  ;;  %v1716_v22 = vor.u32 %v1918_v20, %v1715_v19  ;;  %v1753_v25 = vld [vmem:[#allocation11 + $0x1d4] sm:$0xf0] }
  0xda   :  { %1166 = vmatpush.bf16.msra.mxu2 %v1776_v23  ;;  %v1621_v23 = vld [vmem:[#allocation11 + $0xcc] sm:$0xf0] }
  0xdb   :  { %590 = vmatmul.bf16.vlgmr.msra.gmra.mxu3 %v240_v32  ;;  %616 = vmatmul.bf16.vlgmr.msra.gmra.mxu1 %v240_v32  ;;  %v1624_v26 = vor.u32 %v1893_v21, %v1621_v23  ;;  %v1940_v21 = vld [vmem:[#allocation11 + $0x238] sm:$0xf0]  ;;  %v1871_v23 = vld [vmem:[#allocation11 + $0x10] sm:$0xf0] }
  0xdc   :  { %1177 = vmatpush.bf16.msra.mxu3 %v1612_v31  ;;  %v1930_v31 = vld [vmem:[#allocation11 + $0x1e8] sm:$0xf0]  ;;  %1192 = vmatpush.bf16.msra.mxu0 %v1684_v28  ;;  %v1615_v28 = vld [vmem:[#allocation11 + $0xb0] sm:$0xf] }
  0xdd   :  { %v1764_v33 = vor.u32 %v1930_v31, %v1763_v30  ;;  %v1663_v30 = vld [vmem:[#allocation11 + $0x110] sm:$0xf] }
  0xde   :  { %v237_v42 = vpop.f32.mrf.mxu1 }
  0xdf   :  { %1167 = vmatpush.bf16.msra.mxu2 %v1764_v33 }
  0xe0   :  { %1178 = vmatpush.bf16.msra.mxu3 %v1600_v39  ;;  %v1669_v39 = vld [vmem:[#allocation11 + $0x12c] sm:$0xf0] }
  0xe1   :  { %v1672_v42 = vor.u32 %v1905_v37, %v1669_v39  ;;  %v1741_v37 = vld [vmem:[#allocation11 + $0x1bc] sm:$0xf0] }
  0xe2   :  { %v1744_v39 = vor.u32 %v1923_v36, %v1741_v37 }
  0xe3   :  { %1193 = vmatpush.bf16.msra.mxu0 %v1672_v42  ;;  %1168 = vmatpush.bf16.msra.mxu2 %v1752_v50  ;;  %v1901_v42 = vld [vmem:[#allocation11 + $0x100] sm:$0xf0]  ;;  %v1886_v50 = vld [vmem:[#allocation11 + $0x88] sm:$0xf0] }
  0xe4   :  { %1179 = vmatpush.bf16.msra.mxu3 %v1588_v44  ;;  %v1711_v44 = vld [vmem:[#allocation11 + $0x170] sm:$0xf] }
  0xe5   :  { %v1712_v46 = vor.u32 %v1916_v45, %v1711_v44  ;;  %v1652_v45 = vor.u32 %v1901_v42, %v1651_v41 }
  0xe7   :  { %1194 = vmatpush.bf16.msra.mxu0 %v1660_v54  ;;  %1169 = vmatpush.bf16.msra.mxu2 %v1740_v34  ;;  %v1895_v34 = vld [vmem:[#allocation11 + $0xd0] sm:$0xf0] }
  0xe8   :  { %1180 = vmatpush.bf16.msra.mxu3 %v1576_v53  ;;  %v1789_v53 = vld [vmem:[#allocation11 + $0x21c] sm:$0xf0] }
  0xe9   :  { %v1792_v55 = vor.u32 %v1935_v52, %v1789_v53  ;;  %v1898_v52 = vld [vmem:[#allocation11 + $0xe8] sm:$0xf0]  ;;  %v1592_v53 = vor.u32 %v1886_v50, %v1591_v48  ;;  %v1747_v48 = vld [vmem:[#allocation11 + $0x1b8] sm:$0xf] }
  0xea   :  { %v1640_v54 = vor.u32 %v1898_v52, %v1639_v51  ;;  %v1735_v52 = vld [vmem:[#allocation11 + $0x1a0] sm:$0xf] }
  0xeb   :  { %642 = vmatmul.bf16.vlgmr.msrb.gmra.mxu3 %v240_v32  ;;  %v1620_v32 = vor.u32 %v1894_v29, %v1619_v27  ;;  %1195 = vmatpush.bf16.msra.mxu0 %v1648_v1  ;;  %v1892_v29 = vld [vmem:[#allocation11 + $0xb8] sm:$0xf0]  ;;  %v1567_v1 = vld [vmem:[#allocation11 + $0x50] sm:$0xf] }
  0xec   :  { %1181 = vmatpush.bf16.msra.mxu3 %v1564_v0  ;;  %v1777_v0 = vld [vmem:[#allocation11 + $0x204] sm:$0xf0]  ;;  %1170 = vmatpush.bf16.msra.mxu2 %v1728_v9  ;;  %v1616_v31 = vor.u32 %v1892_v29, %v1615_v28  ;;  %v1556_v9 = vor.u32 %v1877_v7, %v1555_v6  ;;  %v1795_v29 = vld [vmem:[#allocation11 + $0x218] sm:$0xf] }
  0xed   :  { %1158 = vmatpush.bf16.msrb.mxu1 %v1620_v32  ;;  %v1780_v2 = vor.u32 %v1932_v63, %v1777_v0  ;;  %v1904_v32 = vld [vmem:[#allocation11 + $0x118] sm:$0xf0]  ;;  %v1628_v63 = vor.u32 %v1895_v34, %v1627_v61 }
  0xee   :  { %v1664_v33 = vor.u32 %v1904_v32, %v1663_v30  ;;  %v305_v0 = vld [vmem:[#allocation10] sm:$0x7]  ;;  %v1937_v30 = vld [vmem:[#allocation11 + $0x220] sm:$0xf0]  ;;  %v1783_v32 = vld [vmem:[#allocation11 + $0x200] sm:$0xf] }
  0xef   :  { %1196 = vmatpush.bf16.msra.mxu0 %v1636_v13  ;;  %v308_v3 = vperm.slane %v305_v0, 1  ;;  %v1543_v13 = vld [vmem:[#allocation11 + $0x20] sm:$0xf]  ;;  %v309_v37 = vperm.slane %v305_v0, 2 }
  0xf0   :  { %1182 = vmatpush.bf16.msra.mxu3 %v1552_v12  ;;  %v1765_v12 = vld [vmem:[#allocation11 + $0x1ec] sm:$0xf0]  ;;  %1171 = vmatpush.bf16.msra.mxu2 %v1716_v22  ;;  %v1531_v22 = vld [vmem:[#allocation11 + $0x8] sm:$0xf] }
  0xf1   :  { %1203 = vmatpush.bf16.msra.mxu1 %v1804_v43  ;;  %v1768_v14 = vor.u32 %v1929_v11, %v1765_v12  ;;  %v307_v11 = vperm.slane %v305_v0, 0 }
  0xf3   :  { %1197 = vmatpush.bf16.msra.mxu0 %v1624_v26 }
  0xf4   :  { %1183 = vmatpush.bf16.msra.mxu3 %v1540_v24  ;;  %v1926_v24 = vld [vmem:[#allocation11 + $0x1cc] sm:$0xf]  ;;  %1216 = vmatpush.bf16.msrb.mxu2 %v1616_v31  ;;  %v1796_v31 = vor.u32 %v1937_v30, %v1795_v29 }
  0xf5   :  { %1204 = vmatpush.bf16.msra.mxu1 %v1792_v55  ;;  %v1756_v27 = vor.u32 %v1926_v24, %v1753_v25 }
  0xf8   :  { %1184 = vmatpush.bf16.msra.mxu3 %v1528_v38  ;;  %v1603_v38 = vld [vmem:[#allocation11 + $0x98] sm:$0xf] }
  0xf9   :  { %1205 = vmatpush.bf16.msra.mxu1 %v1780_v2  ;;  %v1604_v44 = vor.u32 %v1889_v40, %v1603_v38  ;;  %v1880_v2 = vld [vmem:[#allocation11 + $0x58] sm:$0xf0]  ;;  %v1771_v38 = vld [vmem:[#allocation11 + $0x1e8] sm:$0xf] }
  0xfa   :  { %v1568_v4 = vor.u32 %v1880_v2, %v1567_v1 }
  0xfb   :  { %1217 = vmatpush.bf16.msrb.mxu2 %v1604_v44  ;;  %v1928_v44 = vld [vmem:[#allocation11 + $0x1d8] sm:$0xf0] }
  0xfc   :  { %1229 = vmatpush.bf16.msrb.mxu3 %v1712_v46  ;;  %v1920_v46 = vld [vmem:[#allocation11 + $0x19c] sm:$0xf] }
  0xfd   :  { %1206 = vmatpush.bf16.msra.mxu1 %v1768_v14  ;;  %v1732_v49 = vor.u32 %v1920_v46, %v1729_v47  ;;  %v1874_v14 = vld [vmem:[#allocation11 + $0x28] sm:$0xf0] }
  0xfe   :  { %v1544_v15 = vor.u32 %v1874_v14, %v1543_v13 }
  0xff   :  { %1218 = vmatpush.bf16.msrb.mxu2 %v1592_v53  ;;  %v1922_v53 = vld [vmem:[#allocation11 + $0x1a8] sm:$0xf0] }
 0x100   :  { %1230 = vmatpush.bf16.msrb.mxu3 %v1700_v58  ;;  %v1579_v58 = vld [vmem:[#allocation11 + $0x68] sm:$0xf] }
 0x101   :  { %1207 = vmatpush.bf16.msra.mxu1 %v1756_v27  ;;  %v1580_v62 = vor.u32 %v1883_v60, %v1579_v58 }
 0x103   :  { %1219 = vmatpush.bf16.msrb.mxu2 %v1580_v62  ;;  %v746_v62 = vld [vmem:[%s2225_s6] sm:$0x7]  ;;  %s2140_s6 = smov [#allocation13]  }
 0x104   :  { %1231 = vmatpush.bf16.msrb.mxu3 %v1688_v5  ;;  %v748_v0 = vperm.slane %v746_v62, 0  ;;  %s1264_s8 = sshll.u32 %s2140_s6, 4  ;;  %s1265_s8 = int_to_ptr.vmem [resolvable:$true] %s1264_s8 }
 0x105   :  { %1208 = vmatpush.bf16.msra.mxu1 %v1744_v39  ;;  %v1931_v39 = vld [vmem:[#allocation11 + $0x1f0] sm:$0xf0] }
 0x106   :  { %v1772_v40 = vor.u32 %v1931_v39, %v1771_v38 }
 0x107   :  { %1220 = vmatpush.bf16.msrb.mxu2 %v1568_v4 }
 0x108   :  { %1232 = vmatpush.bf16.msrb.mxu3 %v1676_v18  ;;  %v1807_v18 = vld [vmem:[#allocation11 + $0x230] sm:$0xf] }
 0x109   :  { %1209 = vmatpush.bf16.msra.mxu1 %v1732_v49  ;;  %v1808_v27 = vor.u32 %v1940_v21, %v1807_v18  ;;  %v1925_v49 = vld [vmem:[#allocation11 + $0x1c0] sm:$0xf0]  ;;  %v750_v18 = vperm.slane %v746_v62, 2 }
 0x10a   :  { %v1748_v50 = vor.u32 %v1925_v49, %v1747_v48 }
 0x10b   :  { %1221 = vmatpush.bf16.msrb.mxu2 %v1556_v9 }
 0x10c   :  { %1233 = vmatpush.bf16.msrb.mxu3 %v1664_v33  ;;  %v1934_v33 = vld [vmem:[#allocation11 + $0x208] sm:$0xf0] }
 0x10d   :  { %1210 = vmatpush.bf16.msra.mxu1 %v1720_v59  ;;  %v1784_v36 = vor.u32 %v1934_v33, %v1783_v32 }
 0x10f   :  { %1222 = vmatpush.bf16.msrb.mxu2 %v1544_v15 }
 0x110   :  { %1234 = vmatpush.bf16.msrb.mxu3 %v1652_v45 }
 0x114   :  { %1235 = vmatpush.bf16.msrb.mxu3 %v1640_v54  ;;  %v1736_v54 = vor.u32 %v1922_v53, %v1735_v52 }
 0x118   :  { %1236 = vmatpush.bf16.msrb.mxu3 %v1628_v63  ;;  %v749_v63 = vperm.slane %v746_v62, 1 }
 0x13c   :  { %v2207_v17 = vpop.f32.mrf.mxu0 }
 0x13d   :  { %v605_v8 = vadd.f32 %v2207_v17, %v308_v3  ;;  %v1532_v17 = vor.u32 %v1871_v23, %v1531_v22 }
 0x13f   :  { %1223 = vmatpush.bf16.msrb.mxu2 %v1532_v17 }
 0x142   :  { %v2209_v35 = vpop.f32.mrf.mxu2 }
 0x143   :  { %v579_v19 = vadd.f32 %v2209_v35, %v307_v11 }
 0x144   :  { %v606_v43 = vpop.f32.mrf.mxu0 }
 0x145   :  { %v1759_v43 = vld [vmem:[#allocation11 + $0x1d0] sm:$0xf] }
 0x146   :  { %v1760_v47 = vor.u32 %v1928_v44, %v1759_v43 }
 0x14a   :  { %v580_v55 = vpop.f32.mrf.mxu2 }
 0x14b   :  { %v1723_v55 = vld [vmem:[#allocation11 + $0x188] sm:$0xf] }
 0x14c   :  { %v1724_v57 = vor.u32 %v1919_v56, %v1723_v55 }
 0x152   :  { %v630_v5 = vpop.f32.mrf.mxu2 }
 0x153   :  { %v631_v41 = vadd.f32 %v630_v5, %v309_v37 }
 0x158   :  { %v617_v10 = vpop.f32.mrf.mxu1 }
 0x159   :  { %v618_v12 = vadd.f32 %v617_v10, %v605_v8 }
 0x15a   :  { %v632_v20 = vpop.f32.mrf.mxu2 }
 0x15b   :  { %v648_v16 = vpack.c.bf16 %v618_v12, %v618_v12 }
 0x15d   :  { %1159 = vmatmul.bf16.vlgmr.msrb.gmra.mxu1 %v648_v16 }
 0x15e   :  { %v591_v24 = vpop.f32.mrf.mxu3 }
 0x15f   :  { %v592_v25 = vadd.f32 %v591_v24, %v579_v19 }
 0x160   :  { %v619_v26 = vpop.f32.mrf.mxu1 }
 0x161   :  { %v647_v28 = vpack.c.bf16 %v592_v25, %v592_v25 }
 0x163   :  { %1146 = vmatmul.bf16.vlgmr.msrb.gmra.mxu0 %v647_v28  ;;  %1185 = vmatmul.bf16.vlgmr.msra.gmra.mxu3 %v647_v28 }
 0x164   :  { %1242 = vmatpush.bf16.msrb.mxu0 %v1808_v27 }
 0x166   :  { %v593_v35 = vpop.f32.mrf.mxu3 }
 0x168   :  { %1243 = vmatpush.bf16.msrb.mxu0 %v1796_v31 }
 0x16c   :  { %1244 = vmatpush.bf16.msrb.mxu0 %v1784_v36 }
 0x16e   :  { %v643_v42 = vpop.f32.mrf.mxu3 }
 0x16f   :  { %v644_v45 = vadd.f32 %v643_v42, %v631_v41 }
 0x170   :  { %1245 = vmatpush.bf16.msrb.mxu0 %v1772_v40 }
 0x171   :  { %v649_v46 = vpack.c.bf16 %v644_v45, %v644_v45 }
 0x173   :  { %1172 = vmatmul.bf16.vlgmr.msra.gmra.mxu2 %v649_v46  ;;  %1198 = vmatmul.bf16.vlgmr.msra.gmra.mxu0 %v648_v16 }
 0x174   :  { %1211 = vmatmul.bf16.vlgmr.msra.gmra.mxu1 %v649_v46  ;;  %1237 = vmatmul.bf16.vlgmr.msrb.gmra.mxu3 %v648_v16 }
 0x175   :  { %1246 = vmatpush.bf16.msrb.mxu0 %v1760_v47 }
 0x176   :  { %v645_v51 = vpop.f32.mrf.mxu3 }
 0x179   :  { %1247 = vmatpush.bf16.msrb.mxu0 %v1748_v50 }
 0x17d   :  { %1248 = vmatpush.bf16.msrb.mxu0 %v1736_v54 }
 0x181   :  { %1249 = vmatpush.bf16.msrb.mxu0 %v1724_v57 }
 0x183   :  { %1224 = vmatmul.bf16.vlgmr.msrb.gmra.mxu2 %v647_v28 }
 0x184   :  { %1250 = vmatmul.bf16.vlgmr.msrb.gmra.mxu0 %v649_v46 }
 0x1da   :  { %v1160_v58 = vpop.f32.mrf.mxu1 }
 0x1e0   :  { %v1147_v59 = vpop.f32.mrf.mxu0 }
 0x1e1   :  { %v1148_v4 = vadd.f32 %v1147_v59, %v748_v0 }
 0x1e2   :  { %v1162_v60 = vpop.f32.mrf.mxu1 }
 0x1e3   :  { %v1161_v8 = vadd.f32 %v1160_v58, %v1148_v4 }
 0x1e6   :  { %v1186_v61 = vpop.f32.mrf.mxu3 }
 0x1e7   :  { %v1187_v2 = vadd.f32 %v1186_v61, %v749_v63 }
 0x1e8   :  { %v1149_v34 = vpop.f32.mrf.mxu0 }
 0x1ee   :  { %v1188_v1 = vpop.f32.mrf.mxu3 }
 0x1f0   :  { %v1199_v3 = vpop.f32.mrf.mxu0 }
 0x1f1   :  { %v1200_v5 = vadd.f32 %v1199_v3, %v1187_v2  ;;  %v1212_v6 = vpop.f32.mrf.mxu1 }
 0x1f3   :  { %v1213_v7 = vadd.f32 %v1212_v6, %v1200_v5 }
 0x1f5   :  { %1256 = vst [vmem:[#allocation13 + $0x8] sm:$0xff] %v1213_v7 }
 0x1f6   :  { %v1173_v9 = vpop.f32.mrf.mxu2 }
 0x1f7   :  { %v1174_v10 = vadd.f32 %v1173_v9, %v1161_v8  ;;  %v1238_v11 = vpop.f32.mrf.mxu3 }
 0x1f8   :  { %v1201_v12 = vpop.f32.mrf.mxu0 }
 0x1f9   :  { %1255 = vst [vmem:[#allocation13] sm:$0xff] %v1174_v10  ;;  %v1214_v13 = vpop.f32.mrf.mxu1 }
 0x1fe   :  { %v1175_v14 = vpop.f32.mrf.mxu2 }
 0x1ff   :  { %v1240_v15 = vpop.f32.mrf.mxu3 }
 0x201   :  { %v1251_v16 = vpop.f32.mrf.mxu0 }
 0x206   :  { %v1225_v19 = vpop.f32.mrf.mxu2 }
 0x207   :  { %v1226_v20 = vadd.f32 %v1225_v19, %v750_v18 }
 0x209   :  { %v1239_v21 = vadd.f32 %v1238_v11, %v1226_v20  ;;  %v1253_v22 = vpop.f32.mrf.mxu0 }
 0x20b   :  { %v1252_v23 = vadd.f32 %v1251_v16, %v1239_v21 }
 0x20d   :  { %1258 = vst.msk [vmem:[#allocation13 + $0x10] sm:$0xff] %vm1257_vm2, %v1252_v23 }
 0x20e   :  { %v1227_v24 = vpop.f32.mrf.mxu2  ;;  %1269 = dma.vmem_to_hbm [thread:$0]  %s1265_s8, 384, %s1267_s11, [#allocation4]  }
 0x20f   :  { %2128 = dma.done.wait [#allocation4], 384  }
 0x210   :  { %2129 = vsyncadd [#allocation4], 4294966912 }
 0x211   :  { %1274 = vsyncpa [#allocation3], 1 }
 0x212   :  { %1275 = vsyncpa [#allocation6], 1 }
 0x213   :  { %1276 = vsyncpa [#allocation9], 1 }
 0x214   :  { %1277 = vsyncpa [#allocation12], 1 }
 0x215   :  { %1278 = vsyncpa [#allocation4], 1 }

</bundles_post_ra>
